<compile_context>
chip_gen: v7x
topology: tpu7x:2x2x1
jax: 0.10.0
libtpu: 0.0.40
codegen_flags: <defaults>
</compile_context>

<pallas_src>
import functools

import jax
import jax.numpy as jnp
from jax import lax
from jax.experimental import pallas as pl
from jax.experimental.pallas import tpu as pltpu


_NUM_CLASSES = 5           # the PyTorch module hard-codes 5 classes
_LANES = 128               # vreg lane width
_MAX_TILE_ROWS = 2048      # (5, 2048, 128) f32 block = 5 MiB / input / buffer
                           #   -> 2 inputs x 2 buffers = 20 MiB double-buffered
_SPLIT_BYTES = 2 << 20     # > ~2 MiB of batch-0 data per input: use >= 2 grid
                           #   steps so v7x shards the "parallel" axis over 2 TCs


def _round_up(x, m):
    return (x + m - 1) // m * m


def _sublane_multiple(dtype):
    # f32/i32 -> 8 rows, bf16/f16 -> 16, int8/bool/fp8 -> 32
    return max(8, 32 // max(1, dtype.itemsize))


def _tversky_sums_kernel(pred_ref, gold_ref, out_ref, *,
                         num_tiles, tile_rows, tail_rows):
    """One grid step: a (C, tile_rows, 128) lane-dense slab of batch-0 planes.

    Writes this tile's per-class partial sums into its own output slot:
      out[0] = sum(g * p), out[1] = sum(g), out[2] = sum(p)   (each (C, 1)).
    """
    g = gold_ref[...].astype(jnp.float32)   # "inputs"  in the torch code
    p = pred_ref[...].astype(jnp.float32)   # "targets" in the torch code

    if tail_rows != tile_rows:               # static: only when the grid is ragged
        limit = jnp.where(pl.program_id(0) == num_tiles - 1, tail_rows, tile_rows)
        row = lax.broadcasted_iota(jnp.int32, g.shape, dimension=1)
        keep = row < limit
        g = jnp.where(keep, g, 0.0)           # select (not mul): OOB garbage/NaNs vanish
        p = jnp.where(keep, p, 0.0)

    out_ref[0] = jnp.sum(jnp.sum(g * p, axis=-1), axis=-1, keepdims=True)  # (C, 1)
    out_ref[1] = jnp.sum(jnp.sum(g, axis=-1), axis=-1, keepdims=True)
    out_ref[2] = jnp.sum(jnp.sum(p, axis=-1), axis=-1, keepdims=True)


def tversky_loss(pred, gold):
    """pred, gold: (N, 5, H, W) arrays (NCHW). Returns scalar f32 loss.

    Matches TverskyLoss.forward: uses pred[0] / gold[0], per-class
    intersection / (intersection + 0.6*fp + 0.4*fn + 1e-8), returns
    1 - (sum over the 5 classes) / 5.
    """
    pred = jnp.asarray(pred)
    gold = jnp.asarray(gold)
    N, C, H, W = pred.shape
    assert C == _NUM_CLASSES, "module hard-codes 5 classes"
    assert gold.shape[1:] == (C, H, W)
    L = H * W

    sub = max(_sublane_multiple(pred.dtype), _sublane_multiple(gold.dtype))

    lane_pad = (-L) % _LANES
    if lane_pad:
        # L not lane-aligned: pad ONLY a batch-0 slice (the kernel never reads
        # the other N-1 batches); zero padding contributes 0 to every sum.
        pred_src = jnp.pad(pred.reshape(N, C, L)[:1], ((0, 0), (0, 0), (0, lane_pad)))
        gold_src = jnp.pad(gold.reshape(N, C, L)[:1], ((0, 0), (0, 0), (0, lane_pad)))
    else:
        pred_src, gold_src = pred, gold
    rows = (L + lane_pad) // _LANES
    pred4 = pred_src.reshape(-1, C, rows, _LANES)   # free row-major metadata reshape
    gold4 = gold_src.reshape(-1, C, rows, _LANES)

    # ---- tile selection: biggest lane-dense tile that fits the VMEM budget ----
    bytes_per_row = C * _LANES * max(pred.dtype.itemsize, gold.dtype.itemsize)
    if rows * bytes_per_row <= _SPLIT_BYTES:
        tile_rows, num_tiles = rows, 1            # one step; block dims == array dims
    else:
        tile_rows = min(_MAX_TILE_ROWS, _round_up(pl.cdiv(rows, 2), sub))
        num_tiles = pl.cdiv(rows, tile_rows)      # >= 2 steps: v7x dual-TC sharding
    tail_rows = rows - (num_tiles - 1) * tile_rows

    in_spec = pl.BlockSpec((None, C, tile_rows, _LANES), lambda t: (0, 0, t, 0))
    kernel = functools.partial(_tversky_sums_kernel, num_tiles=num_tiles,
                               tile_rows=tile_rows, tail_rows=tail_rows)
    partials = pl.pallas_call(
        kernel,
        out_shape=jax.ShapeDtypeStruct((num_tiles, 3, C, 1), jnp.float32),
        grid=(num_tiles,),
        in_specs=[in_spec, in_spec],
        out_specs=pl.BlockSpec((None, 3, C, 1), lambda t: (t, 0, 0, 0)),
        compiler_params=pltpu.CompilerParams(
            dimension_semantics=("parallel",),     # shard tiles over both v7x TCs
            vmem_limit_bytes=32 * 1024 * 1024),
    )(pred4, gold4)

    # Tiny scalar epilogue in plain JAX: combine tile partials and finalize.
    sums = jnp.sum(partials, axis=(0, 3))          # (3, C)
    sum_gp, sum_g, sum_p = sums[0], sums[1], sums[2]
    # inter + 0.6*fp + 0.4*fn == 0.6*sum_g + 0.4*sum_p   (since 0.6 + 0.4 == 1)
    tversky = sum_gp / (0.6 * sum_g + 0.4 * sum_p + 1e-8)
    return 1.0 - jnp.sum(tversky) / 5.0


def _reference(pred, gold):
    """Pure-JAX reference reproducing the torch forward exactly."""
    g = jnp.asarray(gold, jnp.float32)[0]
    p = jnp.asarray(pred, jnp.float32)[0]
    tversky = 0.0
    for i in range(5):
        inputs = g[i].reshape(-1)
        targets = p[i].reshape(-1)
        inter = jnp.sum(inputs * targets)
        fp = jnp.sum((1.0 - targets) * inputs)
        fn = jnp.sum(targets * (1.0 - inputs))
        tversky = tversky + inter / (inter + fp * 0.6 + fn * 0.4 + 1e-8)
    return 1.0 - tversky / 5.0


if __name__ == "__main__":
    key = jax.random.PRNGKey(0)
    k1, k2 = jax.random.split(key)
    N, C, H, W = 2, 5, 16, 16
    # pred: soft predictions in [0, 1]; gold: one-hot-like ground truth planes.
    pred = jax.nn.sigmoid(jax.random.normal(k1, (N, C, H, W), jnp.float32))
    gold = (jax.random.uniform(k2, (N, C, H, W), jnp.float32) > 0.7).astype(jnp.float32)

    loss = tversky_loss(pred, gold)
    jax.block_until_ready(loss)

    ref = _reference(pred, gold)
    assert jnp.allclose(loss, ref, rtol=1e-5, atol=1e-6), (loss, ref)
    print("KERNEL_OK")
</pallas_src>

<mosaic_0001>
module attributes {stable_mosaic.version = 11 : i64} {
  func.func @_tversky_sums_kernel(%arg0: i32, %arg1: memref<1x5x2x128xf32, #tpu.memory_space<vmem>>, %arg2: memref<1x5x2x128xf32, #tpu.memory_space<vmem>>, %arg3: memref<1x3x5x1xf32, #tpu.memory_space<vmem>>) attributes {dimension_semantics = [#tpu.dimension_semantics<parallel>], iteration_bounds = array<i64: 1>, scalar_prefetch = 0 : i64, scratch_operands = 0 : i64, tpu.core_type = #tpu.core_type<tc>, window_params = [{transform_indices = @transform_0, window_bounds = array<i64: 1, 5, 2, 128>}, {transform_indices = @transform_1, window_bounds = array<i64: 1, 5, 2, 128>}, {transform_indices = @transform_2, window_bounds = array<i64: 1, 3, 5, 1>}]} {
    %c0 = arith.constant 0 : index
    %c0_0 = arith.constant 0 : index
    %c0_1 = arith.constant 0 : index
    %c0_2 = arith.constant 0 : index
    %0 = vector.load %arg2[%c0, %c0_0, %c0_1, %c0_2] : memref<1x5x2x128xf32, #tpu.memory_space<vmem>>, vector<1x5x2x128xf32>
    %1 = vector.shape_cast %0 : vector<1x5x2x128xf32> to vector<5x2x128xf32>
    %c0_3 = arith.constant 0 : index
    %c0_4 = arith.constant 0 : index
    %c0_5 = arith.constant 0 : index
    %c0_6 = arith.constant 0 : index
    %2 = vector.load %arg1[%c0_3, %c0_4, %c0_5, %c0_6] : memref<1x5x2x128xf32, #tpu.memory_space<vmem>>, vector<1x5x2x128xf32>
    %3 = vector.shape_cast %2 : vector<1x5x2x128xf32> to vector<5x2x128xf32>
    %4 = arith.mulf %1, %3 : vector<5x2x128xf32>
    %cst = arith.constant dense<0.000000e+00> : vector<5x2xf32>
    %5 = vector.multi_reduction <add>, %4, %cst [2] : vector<5x2x128xf32> to vector<5x2xf32>
    %cst_7 = arith.constant dense<0.000000e+00> : vector<5xf32>
    %6 = vector.multi_reduction <add>, %5, %cst_7 [1] : vector<5x2xf32> to vector<5xf32>
    %7 = vector.shape_cast %6 : vector<5xf32> to vector<5x1xf32>
    %c0_8 = arith.constant 0 : index
    %c0_9 = arith.constant 0 : index
    %c0_10 = arith.constant 0 : index
    %c0_11 = arith.constant 0 : index
    %8 = vector.load %arg3[%c0_8, %c0_9, %c0_10, %c0_11] : memref<1x3x5x1xf32, #tpu.memory_space<vmem>>, vector<1x1x5x1xf32>
    %9 = vector.shape_cast %8 : vector<1x1x5x1xf32> to vector<5x1xf32>
    %10 = vector.shape_cast %7 : vector<5x1xf32> to vector<1x1x5x1xf32>
    tpu.vector_store %arg3[%c0_8, %c0_9, %c0_10, %c0_11], %10 {strides = array<i32>} : memref<1x3x5x1xf32, #tpu.memory_space<vmem>>, vector<1x1x5x1xf32>,
    %cst_12 = arith.constant dense<0.000000e+00> : vector<5x2xf32>
    %11 = vector.multi_reduction <add>, %1, %cst_12 [2] : vector<5x2x128xf32> to vector<5x2xf32>
    %cst_13 = arith.constant dense<0.000000e+00> : vector<5xf32>
    %12 = vector.multi_reduction <add>, %11, %cst_13 [1] : vector<5x2xf32> to vector<5xf32>
    %13 = vector.shape_cast %12 : vector<5xf32> to vector<5x1xf32>
    %c0_14 = arith.constant 0 : index
    %c1 = arith.constant 1 : index
    %c0_15 = arith.constant 0 : index
    %c0_16 = arith.constant 0 : index
    %14 = vector.load %arg3[%c0_14, %c1, %c0_15, %c0_16] : memref<1x3x5x1xf32, #tpu.memory_space<vmem>>, vector<1x1x5x1xf32>
    %15 = vector.shape_cast %14 : vector<1x1x5x1xf32> to vector<5x1xf32>
    %16 = vector.shape_cast %13 : vector<5x1xf32> to vector<1x1x5x1xf32>
    tpu.vector_store %arg3[%c0_14, %c1, %c0_15, %c0_16], %16 {strides = array<i32>} : memref<1x3x5x1xf32, #tpu.memory_space<vmem>>, vector<1x1x5x1xf32>,
    %cst_17 = arith.constant dense<0.000000e+00> : vector<5x2xf32>
    %17 = vector.multi_reduction <add>, %3, %cst_17 [2] : vector<5x2x128xf32> to vector<5x2xf32>
    %cst_18 = arith.constant dense<0.000000e+00> : vector<5xf32>
    %18 = vector.multi_reduction <add>, %17, %cst_18 [1] : vector<5x2xf32> to vector<5xf32>
    %19 = vector.shape_cast %18 : vector<5xf32> to vector<5x1xf32>
    %c0_19 = arith.constant 0 : index
    %c2 = arith.constant 2 : index
    %c0_20 = arith.constant 0 : index
    %c0_21 = arith.constant 0 : index
    %20 = vector.load %arg3[%c0_19, %c2, %c0_20, %c0_21] : memref<1x3x5x1xf32, #tpu.memory_space<vmem>>, vector<1x1x5x1xf32>
    %21 = vector.shape_cast %20 : vector<1x1x5x1xf32> to vector<5x1xf32>
    %22 = vector.shape_cast %19 : vector<5x1xf32> to vector<1x1x5x1xf32>
    tpu.vector_store %arg3[%c0_19, %c2, %c0_20, %c0_21], %22 {strides = array<i32>} : memref<1x3x5x1xf32, #tpu.memory_space<vmem>>, vector<1x1x5x1xf32>,
    return
  }
  func.func @transform_0(%arg0: i32) -> (i32, i32, i32, i32) {
    %c0_i32 = arith.constant 0 : i32
    %c0_i32_0 = arith.constant 0 : i32
    %c0_i32_1 = arith.constant 0 : i32
    %c0_i32_2 = arith.constant 0 : i32
    return %c0_i32, %c0_i32_0, %arg0, %c0_i32_1 : i32, i32, i32, i32
  }
  func.func @transform_1(%arg0: i32) -> (i32, i32, i32, i32) {
    %c0_i32 = arith.constant 0 : i32
    %c0_i32_0 = arith.constant 0 : i32
    %c0_i32_1 = arith.constant 0 : i32
    %c0_i32_2 = arith.constant 0 : i32
    return %c0_i32, %c0_i32_0, %arg0, %c0_i32_1 : i32, i32, i32, i32
  }
  func.func @transform_2(%arg0: i32) -> (i32, i32, i32, i32) {
    %c0_i32 = arith.constant 0 : i32
    %c0_i32_0 = arith.constant 0 : i32
    %c0_i32_1 = arith.constant 0 : i32
    %c0_i32_2 = arith.constant 0 : i32
    return %arg0, %c0_i32, %c0_i32_0, %c0_i32_1 : i32, i32, i32, i32
  }
}

</mosaic_0001>

<bundles_post_ra>
// kernel: tpu_custom_call.1
= control target key start
LH: loop header
LB: loop body
LE: loop exit
PB: predicated region body
PF: predicated region fallthrough
CT: control target
= control target key end

     0   :  { %7 = vsyncpa [#allocation3], 0  ;;  %s360_s0 = inlined_call_operand.hbm [shape: f32[2,5,2,128], index: 0, kind: input, shape index: {}]   ;;  %s361_s1 = inlined_call_operand.hbm [shape: f32[2,5,2,128], index: 1, kind: input, shape index: {}]   ;;  %s362_s2 = inlined_call_operand.vmem [shape: f32[1,3,5,1], index: 2, kind: output, shape index: {}]  }
   0x1   :  { %8 = vsyncpa [#allocation5], 0  ;;  %s272_s9 = smov [#allocation2]   ;;  %s224_s13 = scalar_lea.hbm %s360_s0, 160 }
   0x2   :  { %s14_s10 = sshll.u32 %s272_s9, 4  ;;  %p225_p0 = scmp.ne.s32.totalorder %s360_s0, %s224_s13  ;;  %s15_s10 = int_to_ptr.vmem [resolvable:$true] %s14_s10 }
   0x3   :  { %s226_s18 = scalar_lea.hbm %s360_s0, 320  ;;  %p228_p2 = scmp.lt.u32.totalorder %s224_s13, %s360_s0 }
   0x4   :  { %p227_p1 = scmp.lt.u32.totalorder %s226_s18, %s224_s13 }
   0x6   :  { %p229_p3 = por %p228_p2, %p227_p1 }
   0x8   :  { %p230_p4 = pnand %p229_p3, %p225_p0 }
   0xa   :  { %233 = shalt.err (!%p230_p4)
}
   0xb   :  { %s234_s21 = scalar_lea.vmem %s15_s10, 160  ;;  %p239_p6 = scmp.lt.s32.totalorder %s15_s10, %s15_s10 }
   0xc   :  { %p235_p5 = scmp.ne.s32.totalorder %s15_s10, %s234_s21  ;;  %p240_p7 = scmp.lt.s32.totalorder %s234_s21, %s234_s21 }
   0xe   :  { %p241_p8 = por %p240_p7, %p239_p6 }
  0x10   :  { %p242_p9 = pnand %p241_p8, %p235_p5 }
  0x12   :  { %245 = shalt.err (!%p242_p9)
}
  0x13   :  { %s273_s22 = smov 32   ;;  %s274_s23 = smov 2  }
  0x14   :  { %20 = dma.hbm_to_vmem [thread:$0]  %s360_s0, 160, %s15_s10, [#allocation3], %s273_s22, %s273_s22, %s274_s23  }
  0x15   :  { %s275_s26 = smov [#allocation4]   ;;  %s246_s30 = scalar_lea.hbm %s361_s1, 160 }
  0x16   :  { %s26_s27 = sshll.u32 %s275_s26, 4  ;;  %p247_p10 = scmp.ne.s32.totalorder %s361_s1, %s246_s30  ;;  %s27_s27 = int_to_ptr.vmem [resolvable:$true] %s26_s27 }
  0x17   :  { %s248_s7 = scalar_lea.hbm %s361_s1, 320  ;;  %p250_p12 = scmp.lt.u32.totalorder %s246_s30, %s361_s1 }
  0x18   :  { %p249_p11 = scmp.lt.u32.totalorder %s248_s7, %s246_s30 }
  0x1a   :  { %p251_p13 = por %p250_p12, %p249_p11 }
  0x1c   :  { %p252_p0 = pnand %p251_p13, %p247_p10 }
  0x1e   :  { %255 = shalt.err (!%p252_p0)
}
  0x1f   :  { %s256_s0 = scalar_lea.vmem %s27_s27, 160  ;;  %p261_p2 = scmp.lt.s32.totalorder %s27_s27, %s27_s27 }
  0x20   :  { %p257_p1 = scmp.ne.s32.totalorder %s27_s27, %s256_s0  ;;  %p262_p3 = scmp.lt.s32.totalorder %s256_s0, %s256_s0 }
  0x22   :  { %p263_p4 = por %p262_p3, %p261_p2 }
  0x24   :  { %p264_p5 = pnand %p263_p4, %p257_p1 }
  0x26   :  { %267 = shalt.err (!%p264_p5)
}
  0x27   :  { %32 = dma.hbm_to_vmem [thread:$0]  %s361_s1, 160, %s27_s27, [#allocation5], %s273_s22, %s273_s22, %s274_s23  }
  0x28   :  { %268 = dma.done.wait [#allocation3], 160  }
  0x29   :  { %269 = vsyncadd [#allocation3], 4294967136 }
  0x2a   :  { %270 = dma.done.wait [#allocation5], 160  }
  0x2b   :  { %271 = vsyncadd [#allocation5], 4294967136  ;;  %vm54_vm0 = vcmask 1041408   ;;  %v44_v0 = vld [vmem:[#allocation2] sm:$0x3]  ;;  %v75_v36 = vlaneseq  ;;  %vm97_vm1 = vcmask 1041409  }
  0x2c   :  { %v39_v1 = vld [vmem:[#allocation4] sm:$0x3]  ;;  %v40_v2 = vld [vmem:[#allocation4 + $0x2] sm:$0x3]  ;;  %v162_v3 = vsel %vm54_vm0, %v44_v0, 0.0  ;;  %vm99_vm2 = vcmask 1042434  }
  0x2d   :  { %v112_v4 = vsel %vm54_vm0, %v39_v1, 0.0  ;;  %v49_v5 = vmul.f32 %v44_v0, %v39_v1  ;;  %v45_v6 = vld [vmem:[#allocation2 + $0x2] sm:$0x3]  ;;  %163 = vadd.xlane.f32.xlu0 %v162_v3  ;;  %v115_v7 = vsel %vm54_vm0, %v40_v2, 0.0  ;;  %v41_v10 = vld [vmem:[#allocation4 + $0x4] sm:$0x3] }
  0x2e   :  { %113 = vadd.xlane.f32.xlu1 %v112_v4  ;;  %v50_v9 = vmul.f32 %v45_v6, %v40_v2  ;;  %v46_v11 = vld [vmem:[#allocation2 + $0x4] sm:$0x3]  ;;  %v165_v12 = vsel %vm54_vm0, %v45_v6, 0.0  ;;  %v42_v15 = vld [vmem:[#allocation4 + $0x6] sm:$0x3]  ;;  %v118_v17 = vsel %vm54_vm0, %v41_v10, 0.0 }
  0x2f   :  { %v55_v8 = vsel %vm54_vm0, %v49_v5, 0.0  ;;  %v51_v14 = vmul.f32 %v46_v11, %v41_v10  ;;  %v47_v16 = vld [vmem:[#allocation2 + $0x6] sm:$0x3]  ;;  %v168_v21 = vsel %vm54_vm0, %v46_v11, 0.0  ;;  %v43_v22 = vld [vmem:[#allocation4 + $0x8] sm:$0x3] }
  0x30   :  { %v58_v13 = vsel %vm54_vm0, %v50_v9, 0.0  ;;  %v52_v19 = vmul.f32 %v47_v16, %v42_v15  ;;  %v48_v23 = vld [vmem:[#allocation2 + $0x8] sm:$0x3]  ;;  %v171_v24 = vsel %vm54_vm0, %v47_v16, 0.0  ;;  %v121_v25 = vsel %vm54_vm0, %v42_v15, 0.0 }
  0x31   :  { %56 = vadd.xlane.f32.xlu0 %v55_v8  ;;  %v61_v18 = vsel %vm54_vm0, %v51_v14, 0.0  ;;  %v53_v26 = vmul.f32 %v48_v23, %v43_v22  ;;  %v124_v27 = vsel %vm54_vm0, %v43_v22, 0.0  ;;  %v174_v29 = vsel %vm54_vm0, %v48_v23, 0.0 }
  0x32   :  { %116 = vadd.xlane.f32.xlu1 %v115_v7  ;;  %v64_v20 = vsel %vm54_vm0, %v52_v19, 0.0  ;;  %v76_v39 = vand.u32 127, %v75_v36  ;;  %v78_v40 = vshrl.u32 %v75_v36, 7  ;;  %vm101_vm3 = vcmask 1043459  }
  0x33   :  { %v67_v28 = vsel %vm54_vm0, %v53_v26, 0.0  ;;  %vm103_vm4 = vcmask 1044484   ;;  %vm106_vm5 = vcmask 12288   ;;  %vm110_vm6 = vcmask 4096  }
  0x34   :  { %v79_v43 = vsub.s32 %v76_v39, %v78_v40 }
  0x35   :  { %59 = vadd.xlane.f32.xlu0 %v58_v13 }
  0x36   :  { %166 = vadd.xlane.f32.xlu1 %v165_v12 }
  0x39   :  { %62 = vadd.xlane.f32.xlu0 %v61_v18 }
  0x3a   :  { %119 = vadd.xlane.f32.xlu1 %v118_v17 }
  0x3d   :  { %169 = vadd.xlane.f32.xlu0 %v168_v21 }
  0x3e   :  { %65 = vadd.xlane.f32.xlu1 %v64_v20 }
  0x41   :  { %122 = vadd.xlane.f32.xlu0 %v121_v25 }
  0x42   :  { %172 = vadd.xlane.f32.xlu1 %v171_v24 }
  0x45   :  { %68 = vadd.xlane.f32.xlu0 %v67_v28 }
  0x46   :  { %125 = vadd.xlane.f32.xlu1 %v124_v27 }
  0x49   :  { %175 = vadd.xlane.f32.xlu0 %v174_v29 }
  0xba   :  { %v164_v30 = vpop.xlane.xlu0 %163 }
  0xbb   :  { %v114_v31 = vpop.xlane.xlu1 %113  ;;  %v185_v0 = vrot.slane %v164_v30, %v79_v43 }
  0xbc   :  { %v135_v44 = vrot.slane %v114_v31, %v79_v43 }
  0xbe   :  { %v57_v33 = vpop.xlane.xlu0 %56 }
  0xbf   :  { %v117_v32 = vpop.xlane.xlu1 %116  ;;  %v80_v51 = vrot.slane %v57_v33, %v79_v43 }
  0xc0   :  { %v139_v45 = vrot.slane %v117_v32, %v79_v43 }
  0xc2   :  { %v60_v35 = vpop.xlane.xlu0 %59  ;;  %v152_v54 = vsel %vm97_vm1, %v139_v45, %v135_v44 }
  0xc3   :  { %v167_v34 = vpop.xlane.xlu1 %166  ;;  %v84_v46 = vrot.slane %v60_v35, %v79_v43 }
  0xc4   :  { %v189_v55 = vrot.slane %v167_v34, %v79_v43 }
  0xc5   :  { %v98_v56 = vsel %vm97_vm1, %v84_v46, %v80_v51 }
  0xc6   :  { %v63_v38 = vpop.xlane.xlu0 %62  ;;  %v202_v6 = vsel %vm97_vm1, %v189_v55, %v185_v0 }
  0xc7   :  { %v120_v37 = vpop.xlane.xlu1 %119  ;;  %v88_v50 = vrot.slane %v63_v38, %v79_v43 }
  0xc8   :  { %v143_v47 = vrot.slane %v120_v37, %v79_v43 }
  0xc9   :  { %v100_v60 = vsel %vm99_vm2, %v88_v50, %v98_v56 }
  0xca   :  { %v170_v42 = vpop.xlane.xlu0 %169  ;;  %v153_v57 = vsel %vm99_vm2, %v143_v47, %v152_v54 }
  0xcb   :  { %v66_v41 = vpop.xlane.xlu1 %65  ;;  %v193_v61 = vrot.slane %v170_v42, %v79_v43 }
  0xcc   :  { %v92_v52 = vrot.slane %v66_v41, %v79_v43 }
  0xcd   :  { %v203_v10 = vsel %vm99_vm2, %v193_v61, %v202_v6 }
  0xce   :  { %v123_v49 = vpop.xlane.xlu0 %122  ;;  %v102_v3 = vsel %vm101_vm3, %v92_v52, %v100_v60 }
  0xcf   :  { %v173_v48 = vpop.xlane.xlu1 %172  ;;  %v147_v53 = vrot.slane %v123_v49, %v79_v43 }
  0xd0   :  { %v197_v1 = vrot.slane %v173_v48, %v79_v43 }
  0xd1   :  { %v154_v2 = vsel %vm101_vm3, %v147_v53, %v153_v57 }
  0xd2   :  { %v69_v59 = vpop.xlane.xlu0 %68  ;;  %v204_v12 = vsel %vm101_vm3, %v197_v1, %v203_v10 }
  0xd3   :  { %v126_v58 = vpop.xlane.xlu1 %125  ;;  %v96_v63 = vrot.slane %v69_v59, %v79_v43 }
  0xd4   :  { %v151_v62 = vrot.slane %v126_v58, %v79_v43 }
  0xd5   :  { %v104_v5 = vsel %vm103_vm4, %v96_v63, %v102_v3 }
  0xd6   :  { %v155_v4 = vsel %vm103_vm4, %v151_v62, %v154_v2  ;;  %v176_v7 = vpop.xlane.xlu0 %175  ;;  %v107_v9 = vsel %vm106_vm5, %v104_v5, 0.0 }
  0xd7   :  { %v157_v8 = vsel %vm106_vm5, %v155_v4, 0.0  ;;  %v201_v11 = vrot.slane %v176_v7, %v79_v43  ;;  %108 = vadd.xlane.f32.xlu1 %v107_v9 }
  0xd8   :  { %158 = vadd.xlane.f32.xlu0 %v157_v8 }
  0xd9   :  { %v205_v13 = vsel %vm103_vm4, %v201_v11, %v204_v12 }
  0xda   :  { %v207_v14 = vsel %vm106_vm5, %v205_v13, 0.0 }
  0xdb   :  { %208 = vadd.xlane.f32.xlu1 %v207_v14 }
 0x164   :  { %v109_v15 = vpop.xlane.xlu1 %108 }
 0x165   :  { %v159_v16 = vpop.xlane.xlu0 %158  ;;  %111 = vst.msk [vmem:[%s362_s2] sm:$0x1f] %vm110_vm6, %v109_v15 }
 0x166   :  { %218 = vst.msk [vmem:[%s362_s2 + $0x8] sm:$0x1f] %vm110_vm6, %v159_v16 }
 0x168   :  { %v209_v17 = vpop.xlane.xlu1 %208 }
 0x169   :  { %219 = vst.msk [vmem:[%s362_s2 + $0x10] sm:$0x1f] %vm110_vm6, %v209_v17 }
 0x16a   :  { %216 = vsyncpa [#allocation3], 1 }
 0x16b   :  { %217 = vsyncpa [#allocation5], 1 }

</bundles_post_ra>
